<compile_context>
chip_gen: v6e
topology: v6e:2x2x1
jax: 0.10.0
libtpu: 0.0.40
codegen_flags: <defaults>
</compile_context>

<pallas_src>
import numpy as np
import jax
import jax.numpy as jnp
from jax.experimental import pallas as pl
from jax.experimental.pallas import tpu as pltpu


# ---------------------------------------------------------------------------
# Fused Pallas kernel
# ---------------------------------------------------------------------------
def _make_kernel(n_paths, n_ctiles, cout, pp_sizes, col_offsets, compute_dtype):
    paths_with_u = [p for p in range(n_paths) if pp_sizes[p] > 1]
    u_index = {p: i for i, p in enumerate(paths_with_u)}
    n_u = len(paths_with_u)

    def kernel(*refs):
        x_ref = refs[0]                                     # (tC, H*W)
        pmat_ref = refs[1]                                  # (H*W, sum PhPw)
        w_refs = refs[2:2 + n_paths]                        # each (n_ctiles, Cout, tC), resident
        shift_ref = refs[2 + n_paths]                       # (n_paths*Cout, 1) f32
        u_refs = refs[3 + n_paths:3 + n_paths + n_u]        # (PhPw_p, H*W) for pp>1 paths
        o_ref = refs[3 + n_paths + n_u]                     # (tC, H*W)
        acc_refs = refs[4 + n_paths + n_u:
                        4 + n_paths + n_u + n_paths]        # each (Cout, PhPw_p) f32
        copy_sem = refs[4 + n_paths + n_u + n_paths]        # DMA semaphore

        j = pl.program_id(1)
        hw = o_ref.shape[-1]

        # Zero the per-path conv accumulators at the start of each image.
        # NOTE: relies on the last grid axis being innermost (Pallas default iteration
        # order), so j sweeps 0..n_ctiles+n_paths-1 for every b.
        @pl.when(j == 0)
        def _():
            for acc in acc_refs:
                acc[...] = jnp.zeros_like(acc)

        # C-reduction steps: x passthrough + avg-pool (all paths at once) + 1x1 conv acc
        @pl.when(j < n_ctiles)
        def _():
            # Passthrough copy of x into the concatenated output via local DMA so it
            # overlaps the MXU work below (no store-slot pressure from a vreg copy).
            cp = pltpu.make_async_copy(x_ref, o_ref, copy_sem)
            cp.start()

            xb = x_ref[...]                                   # (tC, H*W) bf16
            # All paths' average pooling in a single matmul (lane-dense K = H*W).
            pooled = jnp.dot(xb, pmat_ref[...],
                             preferred_element_type=jnp.float32)   # (tC, sum PhPw) f32
            pooled_c = pooled.astype(compute_dtype)
            for p in range(n_paths):
                pp = pp_sizes[p]
                off = col_offsets[p]
                wp = w_refs[p][j]                             # (Cout, tC), resident weights
                acc_refs[p][...] += jnp.dot(
                    wp, pooled_c[:, off:off + pp],
                    preferred_element_type=jnp.float32)

            cp.wait()

        # Finalize steps: one pyramid path per step.
        for p in range(n_paths):
            @pl.when(j == n_ctiles + p)
            def _(p=p):
                # BN shift + ReLU on the tiny pooled map (before upsampling)
                y = acc_refs[p][...] + shift_ref[p * cout:(p + 1) * cout, :]
                y = jnp.maximum(y, 0.0)                       # (Cout, PhPw_p) f32
                if pp_sizes[p] == 1:
                    out = jnp.broadcast_to(y, (cout, hw))     # global-avg path
                else:
                    u = u_refs[u_index[p]][...]               # (PhPw_p, H*W)
                    out = jnp.dot(y.astype(compute_dtype), u,
                                  preferred_element_type=jnp.float32)
                o_ref[...] = out.astype(o_ref.dtype)          # lane-dense (Cout, H*W) store

    return kernel


# ---------------------------------------------------------------------------
# Host-side matrix / parameter construction
# ---------------------------------------------------------------------------
def _pool_matrix(size, k, out):
    # avg_pool with kernel=stride=k, padding=0 along one axis, as an (out, size) matrix.
    m = np.zeros((out, size), np.float32)
    for a in range(out):
        m[a, a * k:a * k + k] = 1.0 / k
    return m


def _interp_matrix(out_size, in_size):
    # bilinear, align_corners=True along one axis, as an (out_size, in_size) matrix.
    m = np.zeros((out_size, in_size), np.float32)
    if in_size == 1:
        m[:, 0] = 1.0
        return m
    for i in range(out_size):
        src = 0.0 if out_size == 1 else i * (in_size - 1) / (out_size - 1)
        i0 = min(int(np.floor(src)), in_size - 2)
        f = src - i0
        m[i, i0] += 1.0 - f
        m[i, i0 + 1] += f
    return m


def _build_path_matrices(H, W, pool_sizes, dtype):
    # Pooling uses kernel = stride = int(H/p) / int(W/p), padding 0 (trailing rows/cols
    # dropped when H % p != 0) -- matches the PyTorch module's pspnet/training branch.
    pool_blocks, u_mats, pp_sizes = [], [], []
    for p in pool_sizes:
        kh, kw = int(H / p), int(W / p)
        oh = (H - kh) // kh + 1
        ow = (W - kw) // kw + 1
        ph = _pool_matrix(H, kh, oh)
        pw = _pool_matrix(W, kw, ow)
        pool_blocks.append(np.kron(ph, pw))                    # (oh*ow, H*W)
        pp_sizes.append(oh * ow)
        if oh * ow > 1:
            uh = _interp_matrix(H, oh)
            uw = _interp_matrix(W, ow)
            u_mats.append(jnp.asarray(np.kron(uh, uw).T, dtype=dtype))  # (oh*ow, H*W)
    # Largest pooled block at column offset 0 -> cheapest in-kernel lane slicing.
    n_paths = len(pool_sizes)
    order = sorted(range(n_paths), key=lambda p: -pp_sizes[p])
    col_offsets = [0] * n_paths
    off = 0
    blocks_sorted = []
    for p in order:
        col_offsets[p] = off
        off += pp_sizes[p]
        blocks_sorted.append(pool_blocks[p])
    pmat = jnp.asarray(np.concatenate(blocks_sorted, axis=0).T, dtype=dtype)  # (H*W, spp)
    return pmat, u_mats, tuple(pp_sizes), tuple(col_offsets)


def make_params(C, pool_sizes, key):
    # deterministic synthetic parameters: 1x1 conv weight + raw eval-mode BN stats
    cout = C // len(pool_sizes)
    params = []
    for i in range(len(pool_sizes)):
        wk = jax.random.fold_in(key, i)
        w = 0.1 * jax.random.normal(wk, (cout, C), jnp.float32)
        idx = jnp.arange(cout, dtype=jnp.float32)
        params.append(dict(w=w, gamma=1.0 + 0.1 * idx, beta=0.05 * idx,
                           mean=0.01 * (idx + i), var=1.0 + 0.02 * idx, eps=1e-5))
    return params


def _fold_params(params, n_ctiles, tc, dtype):
    # Fold the BN scale into the conv weight; keep only the (f32) shift for the kernel.
    w_blocks, shifts = [], []
    for pr in params:
        inv = pr['gamma'] / jnp.sqrt(pr['var'] + pr['eps'])
        w_s = pr['w'] * inv[:, None]                                  # (Cout, C) f32
        cout = w_s.shape[0]
        # (n_ctiles, Cout, tC): C-tile leading so the kernel block is (Cout, tC), K minor
        wb = jnp.transpose(w_s.reshape(cout, n_ctiles, tc), (1, 0, 2))
        w_blocks.append(wb.astype(dtype))
        shifts.append(pr['beta'] - pr['mean'] * inv)
    shift = jnp.concatenate(shifts).reshape(-1, 1).astype(jnp.float32)
    return w_blocks, shift


def _padded_vmem_bytes(shape, dtype):
    # Crude (sublane, lane) padding model for VMEM footprint accounting.
    itemsize = jnp.dtype(dtype).itemsize
    shape = list(shape)
    shape[-1] = -(-shape[-1] // 128) * 128
    if len(shape) >= 2:
        sub = max(8, 32 // itemsize)
        shape[-2] = -(-shape[-2] // sub) * sub
    n = 1
    for s in shape:
        n *= int(s)
    return n * itemsize


# ---------------------------------------------------------------------------
# Forward (pspnet, fusion_mode='cat', eval-mode BN)
# ---------------------------------------------------------------------------
def pyramid_pooling_forward(x, params, pool_sizes, compute_dtype=jnp.bfloat16):
    # TODO(synk): icnet eval-mode fixed kernel/stride branch, fusion_mode='sum', and
    # training-mode BatchNorm statistics are configuration branches not implemented here.
    B, C, H, W = x.shape
    n_paths = len(pool_sizes)
    assert C % n_paths == 0, "in_channels must be divisible by len(pool_sizes)"
    cout = C // n_paths
    itemsize = jnp.dtype(compute_dtype).itemsize
    sub = 16 if itemsize == 2 else 8
    assert cout % sub == 0, (
        f"per-path channels ({cout}) must be a multiple of {sub} for "
        f"{jnp.dtype(compute_dtype).name} sublane packing")
    tc = cout                       # channel tile == per-path output channel count
    n_ctiles = C // tc              # == n_paths
    hw = H * W
    cout_total = n_paths * cout

    pmat, u_mats, pp_sizes, col_offsets = _build_path_matrices(H, W, pool_sizes,
                                                               compute_dtype)
    w_blocks, shift = _fold_params(params, n_ctiles, tc, compute_dtype)
    spp = pmat.shape[1]

    # free reshape: lane-dense spatial axis; cast big streamed operand to compute_dtype
    x2 = x.reshape(B, C, hw).astype(compute_dtype)

    x_spec = pl.BlockSpec((None, tc, hw),
                          lambda b, j: (b, jnp.minimum(j, n_ctiles - 1), 0))
    pmat_spec = pl.BlockSpec((hw, spp), lambda b, j: (0, 0))
    # 1x1-conv weights fully resident: constant block index -> DMA'd once per core.
    w_specs = [pl.BlockSpec((n_ctiles, cout, tc), lambda b, j: (0, 0, 0))
               for _ in range(n_paths)]
    shift_spec = pl.BlockSpec((cout_total, 1), lambda b, j: (0, 0))
    u_specs = [pl.BlockSpec(u.shape, lambda b, j: (0, 0)) for u in u_mats]

    # --- VMEM accounting (double-buffered pipelined operands, single scratch) ---
    needed = (
        2 * _padded_vmem_bytes((tc, hw), compute_dtype)           # x tiles
        + 2 * _padded_vmem_bytes((tc, hw), compute_dtype)         # out tiles
        + 2 * n_paths * _padded_vmem_bytes((n_ctiles, cout, tc), compute_dtype)
        + 2 * _padded_vmem_bytes((hw, spp), compute_dtype)
        + 2 * _padded_vmem_bytes((cout_total, 1), jnp.float32)
        + 2 * sum(_padded_vmem_bytes(u.shape, compute_dtype) for u in u_mats)
        + sum(_padded_vmem_bytes((cout, pp), jnp.float32) for pp in pp_sizes)
    )
    vmem_limit = max(32 << 20, min(int(needed * 1.5) + (4 << 20), 96 << 20))

    # --- advisory cost estimate so XLA schedules around this memory-bound call ---
    flops = int(2 * B * spp * (C * hw + C * cout + cout * hw))
    bytes_accessed = int(
        B * (C + C + cout_total) * hw * itemsize                  # x read + cat write
        + n_paths * n_ctiles * cout * tc * itemsize               # resident weights
        + (hw * spp + sum(int(u.size) for u in u_mats)) * itemsize
        + cout_total * 4
    )
    cost = pl.CostEstimate(flops=flops, transcendentals=0,
                           bytes_accessed=bytes_accessed)

    out2 = pl.pallas_call(
        _make_kernel(n_paths, n_ctiles, cout, pp_sizes, col_offsets, compute_dtype),
        out_shape=jax.ShapeDtypeStruct((B, C + cout_total, hw), x2.dtype),
        grid_spec=pltpu.PrefetchScalarGridSpec(
            num_scalar_prefetch=0,
            grid=(B, n_ctiles + n_paths),
            in_specs=[x_spec, pmat_spec] + w_specs + [shift_spec] + u_specs,
            out_specs=pl.BlockSpec((None, tc, hw), lambda b, j: (b, j, 0)),
            scratch_shapes=[pltpu.VMEM((cout, pp), jnp.float32) for pp in pp_sizes]
                           + [pltpu.SemaphoreType.DMA(())],
        ),
        compiler_params=pltpu.CompilerParams(
            dimension_semantics=("parallel", "arbitrary"),
            vmem_limit_bytes=vmem_limit,
        ),
        cost_estimate=cost,
    )(x2, pmat, *w_blocks, shift, *u_mats)

    return out2.reshape(B, C + cout_total, H, W)


# ---------------------------------------------------------------------------
# Independent pure-JAX reference (no reuse of the kernel's matrices)
# ---------------------------------------------------------------------------
def _ac_coords(out_size, in_size):
    if in_size == 1 or out_size == 1:
        return np.zeros(out_size, np.int32), np.zeros(out_size, np.float32)
    src = np.arange(out_size, dtype=np.float64) * (in_size - 1) / (out_size - 1)
    i0 = np.minimum(np.floor(src), in_size - 2).astype(np.int32)
    return i0, (src - i0).astype(np.float32)


def _bilinear_align_corners(x, H, W):
    B, C, h, w = x.shape
    i0, fy = _ac_coords(H, h)
    j0, fx = _ac_coords(W, w)
    i1 = np.minimum(i0 + 1, h - 1)
    j1 = np.minimum(j0 + 1, w - 1)
    fy = jnp.asarray(fy)[None, None, :, None]
    fx = jnp.asarray(fx)[None, None, None, :]
    v = x[:, :, i0, :] * (1.0 - fy) + x[:, :, i1, :] * fy
    return v[:, :, :, j0] * (1.0 - fx) + v[:, :, :, j1] * fx


def reference_forward(x, params, pool_sizes):
    B, C, H, W = x.shape
    outs = [x]
    for i, p in enumerate(pool_sizes):
        kh, kw = int(H / p), int(W / p)
        oh = (H - kh) // kh + 1
        ow = (W - kw) // kw + 1
        pooled = x[:, :, :oh * kh, :ow * kw].reshape(B, C, oh, kh, ow, kw).mean(axis=(3, 5))
        pr = params[i]
        y = jnp.einsum('oc,bchw->bohw', pr['w'], pooled)
        inv = pr['gamma'] / jnp.sqrt(pr['var'] + pr['eps'])
        y = (y - pr['mean'][None, :, None, None]) * inv[None, :, None, None] \
            + pr['beta'][None, :, None, None]
        y = jnp.maximum(y, 0.0)
        outs.append(_bilinear_align_corners(y, H, W))
    return jnp.concatenate(outs, axis=1)


if __name__ == "__main__":
    # C=64 with 4 paths -> cout=16, satisfying the bf16 (16,128) sublane-packing rule.
    B, C, H, W = 2, 64, 16, 16
    pool_sizes = (1, 2, 4, 8)
    n_paths = len(pool_sizes)
    cout = C // n_paths

    key = jax.random.PRNGKey(0)
    kx, kw = jax.random.split(key)
    # Quantize x to the bf16 grid so the streamed passthrough copy stays exact vs. ref.
    x = jax.random.normal(kx, (B, C, H, W), jnp.float32)
    x = x.astype(jnp.bfloat16).astype(jnp.float32)
    params = make_params(C, pool_sizes, kw)

    y = pyramid_pooling_forward(x, params, pool_sizes, compute_dtype=jnp.bfloat16)
    y = jax.block_until_ready(y)
    assert y.shape == (B, C + cout * n_paths, H, W), y.shape

    y_ref = reference_forward(x, params, pool_sizes)
    np.testing.assert_allclose(np.asarray(y, dtype=np.float32), np.asarray(y_ref),
                               rtol=3e-2, atol=3e-2)

    print("KERNEL_OK")
</pallas_src>

<mosaic_0001>
module attributes {stable_mosaic.version = 11 : i64} {
  func.func @kernel(%arg0: i32, %arg1: i32, %arg2: memref<1x16x256xbf16, #tpu.memory_space<vmem>>, %arg3: memref<256x85xbf16, #tpu.memory_space<vmem>>, %arg4: memref<4x16x16xbf16, #tpu.memory_space<vmem>>, %arg5: memref<4x16x16xbf16, #tpu.memory_space<vmem>>, %arg6: memref<4x16x16xbf16, #tpu.memory_space<vmem>>, %arg7: memref<4x16x16xbf16, #tpu.memory_space<vmem>>, %arg8: memref<64x1xf32, #tpu.memory_space<vmem>>, %arg9: memref<4x256xbf16, #tpu.memory_space<vmem>>, %arg10: memref<16x256xbf16, #tpu.memory_space<vmem>>, %arg11: memref<64x256xbf16, #tpu.memory_space<vmem>>, %arg12: memref<1x16x256xbf16, #tpu.memory_space<vmem>>, %arg13: memref<16x1xf32, #tpu.memory_space<vmem>>, %arg14: memref<16x4xf32, #tpu.memory_space<vmem>>, %arg15: memref<16x16xf32, #tpu.memory_space<vmem>>, %arg16: memref<16x64xf32, #tpu.memory_space<vmem>>, %arg17: memref<!tpu.dma_semaphore, #tpu.memory_space<semaphore_mem>>) attributes {dimension_semantics = [#tpu.dimension_semantics<parallel>, #tpu.dimension_semantics<arbitrary>], iteration_bounds = array<i64: 2, 8>, scalar_prefetch = 0 : i64, scratch_operands = 5 : i64, tpu.core_type = #tpu.core_type<tc>, window_params = [{transform_indices = @transform_0, window_bounds = array<i64: 1, 16, 256>}, {pipeline_mode = #tpu.pipeline_mode<synchronous>, transform_indices = @transform_1, window_bounds = array<i64: 256, 85>}, {pipeline_mode = #tpu.pipeline_mode<synchronous>, transform_indices = @transform_2, window_bounds = array<i64: 4, 16, 16>}, {pipeline_mode = #tpu.pipeline_mode<synchronous>, transform_indices = @transform_3, window_bounds = array<i64: 4, 16, 16>}, {pipeline_mode = #tpu.pipeline_mode<synchronous>, transform_indices = @transform_4, window_bounds = array<i64: 4, 16, 16>}, {pipeline_mode = #tpu.pipeline_mode<synchronous>, transform_indices = @transform_5, window_bounds = array<i64: 4, 16, 16>}, {pipeline_mode = #tpu.pipeline_mode<synchronous>, transform_indices = @transform_6, window_bounds = array<i64: 64, 1>}, {pipeline_mode = #tpu.pipeline_mode<synchronous>, transform_indices = @transform_7, window_bounds = array<i64: 4, 256>}, {pipeline_mode = #tpu.pipeline_mode<synchronous>, transform_indices = @transform_8, window_bounds = array<i64: 16, 256>}, {pipeline_mode = #tpu.pipeline_mode<synchronous>, transform_indices = @transform_9, window_bounds = array<i64: 64, 256>}, {transform_indices = @transform_10, window_bounds = array<i64: 1, 16, 256>}]} {
    %c0_i32 = arith.constant 0 : i32
    %0 = arith.cmpi eq, %arg1, %c0_i32 : i32
    %1 = arith.extui %0 : i1 to i32
    %c0_i32_0 = arith.constant 0 : i32
    %2 = arith.cmpi ne, %1, %c0_i32_0 : i32
    scf.if %2 {
      %cst = arith.constant 0.000000e+00 : f32
      %18 = vector.broadcast %cst : f32 to vector<16x1xf32>
      %c0 = arith.constant 0 : index
      %c0_7 = arith.constant 0 : index
      %19 = vector.load %arg13[%c0, %c0_7] : memref<16x1xf32, #tpu.memory_space<vmem>>, vector<16x1xf32>
      tpu.vector_store %arg13[%c0, %c0_7], %18 {strides = array<i32>} : memref<16x1xf32, #tpu.memory_space<vmem>>, vector<16x1xf32>,
      %cst_8 = arith.constant 0.000000e+00 : f32
      %20 = vector.broadcast %cst_8 : f32 to vector<16x4xf32>
      %c0_9 = arith.constant 0 : index
      %c0_10 = arith.constant 0 : index
      %21 = vector.load %arg14[%c0_9, %c0_10] : memref<16x4xf32, #tpu.memory_space<vmem>>, vector<16x4xf32>
      tpu.vector_store %arg14[%c0_9, %c0_10], %20 {strides = array<i32>} : memref<16x4xf32, #tpu.memory_space<vmem>>, vector<16x4xf32>,
      %cst_11 = arith.constant 0.000000e+00 : f32
      %22 = vector.broadcast %cst_11 : f32 to vector<16x16xf32>
      %c0_12 = arith.constant 0 : index
      %c0_13 = arith.constant 0 : index
      %23 = vector.load %arg15[%c0_12, %c0_13] : memref<16x16xf32, #tpu.memory_space<vmem>>, vector<16x16xf32>
      tpu.vector_store %arg15[%c0_12, %c0_13], %22 {strides = array<i32>} : memref<16x16xf32, #tpu.memory_space<vmem>>, vector<16x16xf32>,
      %cst_14 = arith.constant 0.000000e+00 : f32
      %24 = vector.broadcast %cst_14 : f32 to vector<16x64xf32>
      %c0_15 = arith.constant 0 : index
      %c0_16 = arith.constant 0 : index
      %25 = vector.load %arg16[%c0_15, %c0_16] : memref<16x64xf32, #tpu.memory_space<vmem>>, vector<16x64xf32>
      tpu.vector_store %arg16[%c0_15, %c0_16], %24 {strides = array<i32>} : memref<16x64xf32, #tpu.memory_space<vmem>>, vector<16x64xf32>,
    } else {
    }
    %c4_i32 = arith.constant 4 : i32
    %3 = arith.cmpi slt, %arg1, %c4_i32 : i32
    %4 = arith.extui %3 : i1 to i32
    %c0_i32_1 = arith.constant 0 : i32
    %5 = arith.cmpi ne, %4, %c0_i32_1 : i32
    scf.if %5 {
      tpu.enqueue_dma source(%arg2 : memref<1x16x256xbf16, #tpu.memory_space<vmem>>) target(%arg12 : memref<1x16x256xbf16, #tpu.memory_space<vmem>>) target_semaphore(%arg17 : memref<!tpu.dma_semaphore, #tpu.memory_space<semaphore_mem>>)
      %c0 = arith.constant 0 : index
      %c0_7 = arith.constant 0 : index
      %c0_8 = arith.constant 0 : index
      %18 = vector.load %arg2[%c0, %c0_7, %c0_8] : memref<1x16x256xbf16, #tpu.memory_space<vmem>>, vector<1x16x256xbf16>
      %19 = vector.shape_cast %18 : vector<1x16x256xbf16> to vector<16x256xbf16>
      %c0_9 = arith.constant 0 : index
      %c0_10 = arith.constant 0 : index
      %20 = vector.load %arg3[%c0_9, %c0_10] : memref<256x85xbf16, #tpu.memory_space<vmem>>, vector<256x85xbf16>
      %cst = arith.constant dense<0.000000e+00> : vector<16x85xf32>
      %21 = tpu.matmul %19, %20, %cst {dimension_numbers = #tpu.dot_dimension_numbers<[1], [0], [0], [1], [0, 0, 1, 1], [], []>} : vector<16x256xbf16>, vector<256x85xbf16>, vector<16x85xf32> -> vector<16x85xf32>
      %22 = arith.truncf %21 : vector<16x85xf32> to vector<16x85xbf16>
      %23 = arith.index_cast %arg1 : i32 to index
      %c0_11 = arith.constant 0 : index
      %c0_12 = arith.constant 0 : index
      %24 = vector.load %arg4[%23, %c0_11, %c0_12] : memref<4x16x16xbf16, #tpu.memory_space<vmem>>, vector<1x16x16xbf16>
      %25 = vector.shape_cast %24 : vector<1x16x16xbf16> to vector<16x16xbf16>
      %c0_13 = arith.constant 0 : index
      %c0_14 = arith.constant 0 : index
      %26 = vector.load %arg13[%c0_13, %c0_14] : memref<16x1xf32, #tpu.memory_space<vmem>>, vector<16x1xf32>
      %27 = vector.extract_strided_slice %22 {offsets = [0, 84], sizes = [16, 1], strides = [1, 1]} : vector<16x85xbf16> to vector<16x1xbf16>
      %cst_15 = arith.constant dense<0.000000e+00> : vector<16x1xf32>
      %28 = tpu.matmul %25, %27, %cst_15 {dimension_numbers = #tpu.dot_dimension_numbers<[1], [0], [0], [1], [0, 0, 1, 1], [], []>} : vector<16x16xbf16>, vector<16x1xbf16>, vector<16x1xf32> -> vector<16x1xf32>
      %29 = arith.addf %26, %28 : vector<16x1xf32>
      %c0_16 = arith.constant 0 : index
      %c0_17 = arith.constant 0 : index
      %30 = vector.load %arg13[%c0_16, %c0_17] : memref<16x1xf32, #tpu.memory_space<vmem>>, vector<16x1xf32>
      tpu.vector_store %arg13[%c0_16, %c0_17], %29 {strides = array<i32>} : memref<16x1xf32, #tpu.memory_space<vmem>>, vector<16x1xf32>,
      %31 = arith.index_cast %arg1 : i32 to index
      %c0_18 = arith.constant 0 : index
      %c0_19 = arith.constant 0 : index
      %32 = vector.load %arg5[%31, %c0_18, %c0_19] : memref<4x16x16xbf16, #tpu.memory_space<vmem>>, vector<1x16x16xbf16>
      %33 = vector.shape_cast %32 : vector<1x16x16xbf16> to vector<16x16xbf16>
      %c0_20 = arith.constant 0 : index
      %c0_21 = arith.constant 0 : index
      %34 = vector.load %arg14[%c0_20, %c0_21] : memref<16x4xf32, #tpu.memory_space<vmem>>, vector<16x4xf32>
      %35 = vector.extract_strided_slice %22 {offsets = [0, 80], sizes = [16, 4], strides = [1, 1]} : vector<16x85xbf16> to vector<16x4xbf16>
      %cst_22 = arith.constant dense<0.000000e+00> : vector<16x4xf32>
      %36 = tpu.matmul %33, %35, %cst_22 {dimension_numbers = #tpu.dot_dimension_numbers<[1], [0], [0], [1], [0, 0, 1, 1], [], []>} : vector<16x16xbf16>, vector<16x4xbf16>, vector<16x4xf32> -> vector<16x4xf32>
      %37 = arith.addf %34, %36 : vector<16x4xf32>
      %c0_23 = arith.constant 0 : index
      %c0_24 = arith.constant 0 : index
      %38 = vector.load %arg14[%c0_23, %c0_24] : memref<16x4xf32, #tpu.memory_space<vmem>>, vector<16x4xf32>
      tpu.vector_store %arg14[%c0_23, %c0_24], %37 {strides = array<i32>} : memref<16x4xf32, #tpu.memory_space<vmem>>, vector<16x4xf32>,
      %39 = arith.index_cast %arg1 : i32 to index
      %c0_25 = arith.constant 0 : index
      %c0_26 = arith.constant 0 : index
      %40 = vector.load %arg6[%39, %c0_25, %c0_26] : memref<4x16x16xbf16, #tpu.memory_space<vmem>>, vector<1x16x16xbf16>
      %41 = vector.shape_cast %40 : vector<1x16x16xbf16> to vector<16x16xbf16>
      %c0_27 = arith.constant 0 : index
      %c0_28 = arith.constant 0 : index
      %42 = vector.load %arg15[%c0_27, %c0_28] : memref<16x16xf32, #tpu.memory_space<vmem>>, vector<16x16xf32>
      %43 = vector.extract_strided_slice %22 {offsets = [0, 64], sizes = [16, 16], strides = [1, 1]} : vector<16x85xbf16> to vector<16x16xbf16>
      %cst_29 = arith.constant dense<0.000000e+00> : vector<16x16xf32>
      %44 = tpu.matmul %41, %43, %cst_29 {dimension_numbers = #tpu.dot_dimension_numbers<[1], [0], [0], [1], [0, 0, 1, 1], [], []>} : vector<16x16xbf16>, vector<16x16xbf16>, vector<16x16xf32> -> vector<16x16xf32>
      %45 = arith.addf %42, %44 : vector<16x16xf32>
      %c0_30 = arith.constant 0 : index
      %c0_31 = arith.constant 0 : index
      %46 = vector.load %arg15[%c0_30, %c0_31] : memref<16x16xf32, #tpu.memory_space<vmem>>, vector<16x16xf32>
      tpu.vector_store %arg15[%c0_30, %c0_31], %45 {strides = array<i32>} : memref<16x16xf32, #tpu.memory_space<vmem>>, vector<16x16xf32>,
      %47 = arith.index_cast %arg1 : i32 to index
      %c0_32 = arith.constant 0 : index
      %c0_33 = arith.constant 0 : index
      %48 = vector.load %arg7[%47, %c0_32, %c0_33] : memref<4x16x16xbf16, #tpu.memory_space<vmem>>, vector<1x16x16xbf16>
      %49 = vector.shape_cast %48 : vector<1x16x16xbf16> to vector<16x16xbf16>
      %c0_34 = arith.constant 0 : index
      %c0_35 = arith.constant 0 : index
      %50 = vector.load %arg16[%c0_34, %c0_35] : memref<16x64xf32, #tpu.memory_space<vmem>>, vector<16x64xf32>
      %51 = vector.extract_strided_slice %22 {offsets = [0, 0], sizes = [16, 64], strides = [1, 1]} : vector<16x85xbf16> to vector<16x64xbf16>
      %cst_36 = arith.constant dense<0.000000e+00> : vector<16x64xf32>
      %52 = tpu.matmul %49, %51, %cst_36 {dimension_numbers = #tpu.dot_dimension_numbers<[1], [0], [0], [1], [0, 0, 1, 1], [], []>} : vector<16x16xbf16>, vector<16x64xbf16>, vector<16x64xf32> -> vector<16x64xf32>
      %53 = arith.addf %50, %52 : vector<16x64xf32>
      %c0_37 = arith.constant 0 : index
      %c0_38 = arith.constant 0 : index
      %54 = vector.load %arg16[%c0_37, %c0_38] : memref<16x64xf32, #tpu.memory_space<vmem>>, vector<16x64xf32>
      tpu.vector_store %arg16[%c0_37, %c0_38], %53 {strides = array<i32>} : memref<16x64xf32, #tpu.memory_space<vmem>>, vector<16x64xf32>,
      tpu.wait_dma2 semaphore(%arg17 : memref<!tpu.dma_semaphore, #tpu.memory_space<semaphore_mem>>) src(%arg2 : memref<1x16x256xbf16, #tpu.memory_space<vmem>>) dst(%arg12 : memref<1x16x256xbf16, #tpu.memory_space<vmem>>)
    } else {
    }
    %c4_i32_2 = arith.constant 4 : i32
    %6 = arith.cmpi eq, %arg1, %c4_i32_2 : i32
    %7 = arith.extui %6 : i1 to i32
    %c0_i32_3 = arith.constant 0 : i32
    %8 = arith.cmpi ne, %7, %c0_i32_3 : i32
    scf.if %8 {
      %c0 = arith.constant 0 : index
      %c0_7 = arith.constant 0 : index
      %18 = vector.load %arg13[%c0, %c0_7] : memref<16x1xf32, #tpu.memory_space<vmem>>, vector<16x1xf32>
      %c0_8 = arith.constant 0 : index
      %c0_9 = arith.constant 0 : index
      %19 = vector.load %arg8[%c0_8, %c0_9] : memref<64x1xf32, #tpu.memory_space<vmem>>, vector<16x1xf32>
      %20 = arith.addf %18, %19 : vector<16x1xf32>
      %cst = arith.constant 0.000000e+00 : f32
      %21 = vector.broadcast %cst : f32 to vector<16x1xf32>
      %22 = arith.maximumf %20, %21 : vector<16x1xf32>
      %23 = vector.shape_cast %22 : vector<16x1xf32> to vector<16x1xf32>
      %24 = vector.broadcast %23 : vector<16x1xf32> to vector<16x256xf32>
      %25 = arith.truncf %24 : vector<16x256xf32> to vector<16x256xbf16>
      %c0_10 = arith.constant 0 : index
      %c0_11 = arith.constant 0 : index
      %c0_12 = arith.constant 0 : index
      %26 = vector.load %arg12[%c0_10, %c0_11, %c0_12] : memref<1x16x256xbf16, #tpu.memory_space<vmem>>, vector<1x16x256xbf16>
      %27 = vector.shape_cast %26 : vector<1x16x256xbf16> to vector<16x256xbf16>
      %28 = vector.shape_cast %25 : vector<16x256xbf16> to vector<1x16x256xbf16>
      tpu.vector_store %arg12[%c0_10, %c0_11, %c0_12], %28 {strides = array<i32>} : memref<1x16x256xbf16, #tpu.memory_space<vmem>>, vector<1x16x256xbf16>,
    } else {
    }
    %c5_i32 = arith.constant 5 : i32
    %9 = arith.cmpi eq, %arg1, %c5_i32 : i32
    %10 = arith.extui %9 : i1 to i32
    %c0_i32_4 = arith.constant 0 : i32
    %11 = arith.cmpi ne, %10, %c0_i32_4 : i32
    scf.if %11 {
      %c0 = arith.constant 0 : index
      %c0_7 = arith.constant 0 : index
      %18 = vector.load %arg14[%c0, %c0_7] : memref<16x4xf32, #tpu.memory_space<vmem>>, vector<16x4xf32>
      %c16 = arith.constant 16 : index
      %c0_8 = arith.constant 0 : index
      %19 = vector.load %arg8[%c16, %c0_8] : memref<64x1xf32, #tpu.memory_space<vmem>>, vector<16x1xf32>
      %20 = vector.broadcast %19 : vector<16x1xf32> to vector<16x4xf32>
      %21 = arith.addf %18, %20 : vector<16x4xf32>
      %cst = arith.constant 0.000000e+00 : f32
      %22 = vector.broadcast %cst : f32 to vector<16x4xf32>
      %23 = arith.maximumf %21, %22 : vector<16x4xf32>
      %c0_9 = arith.constant 0 : index
      %c0_10 = arith.constant 0 : index
      %24 = vector.load %arg9[%c0_9, %c0_10] : memref<4x256xbf16, #tpu.memory_space<vmem>>, vector<4x256xbf16>
      %25 = arith.truncf %23 : vector<16x4xf32> to vector<16x4xbf16>
      %cst_11 = arith.constant dense<0.000000e+00> : vector<16x256xf32>
      %26 = tpu.matmul %25, %24, %cst_11 {dimension_numbers = #tpu.dot_dimension_numbers<[1], [0], [0], [1], [0, 0, 1, 1], [], []>} : vector<16x4xbf16>, vector<4x256xbf16>, vector<16x256xf32> -> vector<16x256xf32>
      %27 = arith.truncf %26 : vector<16x256xf32> to vector<16x256xbf16>
      %c0_12 = arith.constant 0 : index
      %c0_13 = arith.constant 0 : index
      %c0_14 = arith.constant 0 : index
      %28 = vector.load %arg12[%c0_12, %c0_13, %c0_14] : memref<1x16x256xbf16, #tpu.memory_space<vmem>>, vector<1x16x256xbf16>
      %29 = vector.shape_cast %28 : vector<1x16x256xbf16> to vector<16x256xbf16>
      %30 = vector.shape_cast %27 : vector<16x256xbf16> to vector<1x16x256xbf16>
      tpu.vector_store %arg12[%c0_12, %c0_13, %c0_14], %30 {strides = array<i32>} : memref<1x16x256xbf16, #tpu.memory_space<vmem>>, vector<1x16x256xbf16>,
    } else {
    }
    %c6_i32 = arith.constant 6 : i32
    %12 = arith.cmpi eq, %arg1, %c6_i32 : i32
    %13 = arith.extui %12 : i1 to i32
    %c0_i32_5 = arith.constant 0 : i32
    %14 = arith.cmpi ne, %13, %c0_i32_5 : i32
    scf.if %14 {
      %c0 = arith.constant 0 : index
      %c0_7 = arith.constant 0 : index
      %18 = vector.load %arg15[%c0, %c0_7] : memref<16x16xf32, #tpu.memory_space<vmem>>, vector<16x16xf32>
      %c32 = arith.constant 32 : index
      %c0_8 = arith.constant 0 : index
      %19 = vector.load %arg8[%c32, %c0_8] : memref<64x1xf32, #tpu.memory_space<vmem>>, vector<16x1xf32>
      %20 = vector.broadcast %19 : vector<16x1xf32> to vector<16x16xf32>
      %21 = arith.addf %18, %20 : vector<16x16xf32>
      %cst = arith.constant 0.000000e+00 : f32
      %22 = vector.broadcast %cst : f32 to vector<16x16xf32>
      %23 = arith.maximumf %21, %22 : vector<16x16xf32>
      %c0_9 = arith.constant 0 : index
      %c0_10 = arith.constant 0 : index
      %24 = vector.load %arg10[%c0_9, %c0_10] : memref<16x256xbf16, #tpu.memory_space<vmem>>, vector<16x256xbf16>
      %25 = arith.truncf %23 : vector<16x16xf32> to vector<16x16xbf16>
      %cst_11 = arith.constant dense<0.000000e+00> : vector<16x256xf32>
      %26 = tpu.matmul %25, %24, %cst_11 {dimension_numbers = #tpu.dot_dimension_numbers<[1], [0], [0], [1], [0, 0, 1, 1], [], []>} : vector<16x16xbf16>, vector<16x256xbf16>, vector<16x256xf32> -> vector<16x256xf32>
      %27 = arith.truncf %26 : vector<16x256xf32> to vector<16x256xbf16>
      %c0_12 = arith.constant 0 : index
      %c0_13 = arith.constant 0 : index
      %c0_14 = arith.constant 0 : index
      %28 = vector.load %arg12[%c0_12, %c0_13, %c0_14] : memref<1x16x256xbf16, #tpu.memory_space<vmem>>, vector<1x16x256xbf16>
      %29 = vector.shape_cast %28 : vector<1x16x256xbf16> to vector<16x256xbf16>
      %30 = vector.shape_cast %27 : vector<16x256xbf16> to vector<1x16x256xbf16>
      tpu.vector_store %arg12[%c0_12, %c0_13, %c0_14], %30 {strides = array<i32>} : memref<1x16x256xbf16, #tpu.memory_space<vmem>>, vector<1x16x256xbf16>,
    } else {
    }
    %c7_i32 = arith.constant 7 : i32
    %15 = arith.cmpi eq, %arg1, %c7_i32 : i32
    %16 = arith.extui %15 : i1 to i32
    %c0_i32_6 = arith.constant 0 : i32
    %17 = arith.cmpi ne, %16, %c0_i32_6 : i32
    scf.if %17 {
      %c0 = arith.constant 0 : index
      %c0_7 = arith.constant 0 : index
      %18 = vector.load %arg16[%c0, %c0_7] : memref<16x64xf32, #tpu.memory_space<vmem>>, vector<16x64xf32>
      %c48 = arith.constant 48 : index
      %c0_8 = arith.constant 0 : index
      %19 = vector.load %arg8[%c48, %c0_8] : memref<64x1xf32, #tpu.memory_space<vmem>>, vector<16x1xf32>
      %20 = vector.broadcast %19 : vector<16x1xf32> to vector<16x64xf32>
      %21 = arith.addf %18, %20 : vector<16x64xf32>
      %cst = arith.constant 0.000000e+00 : f32
      %22 = vector.broadcast %cst : f32 to vector<16x64xf32>
      %23 = arith.maximumf %21, %22 : vector<16x64xf32>
      %c0_9 = arith.constant 0 : index
      %c0_10 = arith.constant 0 : index
      %24 = vector.load %arg11[%c0_9, %c0_10] : memref<64x256xbf16, #tpu.memory_space<vmem>>, vector<64x256xbf16>
      %25 = arith.truncf %23 : vector<16x64xf32> to vector<16x64xbf16>
      %cst_11 = arith.constant dense<0.000000e+00> : vector<16x256xf32>
      %26 = tpu.matmul %25, %24, %cst_11 {dimension_numbers = #tpu.dot_dimension_numbers<[1], [0], [0], [1], [0, 0, 1, 1], [], []>} : vector<16x64xbf16>, vector<64x256xbf16>, vector<16x256xf32> -> vector<16x256xf32>
      %27 = arith.truncf %26 : vector<16x256xf32> to vector<16x256xbf16>
      %c0_12 = arith.constant 0 : index
      %c0_13 = arith.constant 0 : index
      %c0_14 = arith.constant 0 : index
      %28 = vector.load %arg12[%c0_12, %c0_13, %c0_14] : memref<1x16x256xbf16, #tpu.memory_space<vmem>>, vector<1x16x256xbf16>
      %29 = vector.shape_cast %28 : vector<1x16x256xbf16> to vector<16x256xbf16>
      %30 = vector.shape_cast %27 : vector<16x256xbf16> to vector<1x16x256xbf16>
      tpu.vector_store %arg12[%c0_12, %c0_13, %c0_14], %30 {strides = array<i32>} : memref<1x16x256xbf16, #tpu.memory_space<vmem>>, vector<1x16x256xbf16>,
    } else {
    }
    return
  }
  func.func @transform_0(%arg0: i32, %arg1: i32) -> (i32, i32, i32) {
    %c3_i32 = arith.constant 3 : i32
    %0 = arith.minsi %arg1, %c3_i32 : i32
    %c0_i32 = arith.constant 0 : i32
    %c0_i32_0 = arith.constant 0 : i32
    return %arg0, %0, %c0_i32 : i32, i32, i32
  }
  func.func @transform_1(%arg0: i32, %arg1: i32) -> (i32, i32) {
    %c0_i32 = arith.constant 0 : i32
    %c0_i32_0 = arith.constant 0 : i32
    %c0_i32_1 = arith.constant 0 : i32
    return %c0_i32, %c0_i32_0 : i32, i32
  }
  func.func @transform_2(%arg0: i32, %arg1: i32) -> (i32, i32, i32) {
    %c0_i32 = arith.constant 0 : i32
    %c0_i32_0 = arith.constant 0 : i32
    %c0_i32_1 = arith.constant 0 : i32
    %c0_i32_2 = arith.constant 0 : i32
    return %c0_i32, %c0_i32_0, %c0_i32_1 : i32, i32, i32
  }
  func.func @transform_3(%arg0: i32, %arg1: i32) -> (i32, i32, i32) {
    %c0_i32 = arith.constant 0 : i32
    %c0_i32_0 = arith.constant 0 : i32
    %c0_i32_1 = arith.constant 0 : i32
    %c0_i32_2 = arith.constant 0 : i32
    return %c0_i32, %c0_i32_0, %c0_i32_1 : i32, i32, i32
  }
  func.func @transform_4(%arg0: i32, %arg1: i32) -> (i32, i32, i32) {
    %c0_i32 = arith.constant 0 : i32
    %c0_i32_0 = arith.constant 0 : i32
    %c0_i32_1 = arith.constant 0 : i32
    %c0_i32_2 = arith.constant 0 : i32
    return %c0_i32, %c0_i32_0, %c0_i32_1 : i32, i32, i32
  }
  func.func @transform_5(%arg0: i32, %arg1: i32) -> (i32, i32, i32) {
    %c0_i32 = arith.constant 0 : i32
    %c0_i32_0 = arith.constant 0 : i32
    %c0_i32_1 = arith.constant 0 : i32
    %c0_i32_2 = arith.constant 0 : i32
    return %c0_i32, %c0_i32_0, %c0_i32_1 : i32, i32, i32
  }
  func.func @transform_6(%arg0: i32, %arg1: i32) -> (i32, i32) {
    %c0_i32 = arith.constant 0 : i32
    %c0_i32_0 = arith.constant 0 : i32
    %c0_i32_1 = arith.constant 0 : i32
    return %c0_i32, %c0_i32_0 : i32, i32
  }
  func.func @transform_7(%arg0: i32, %arg1: i32) -> (i32, i32) {
    %c0_i32 = arith.constant 0 : i32
    %c0_i32_0 = arith.constant 0 : i32
    %c0_i32_1 = arith.constant 0 : i32
    return %c0_i32, %c0_i32_0 : i32, i32
  }
  func.func @transform_8(%arg0: i32, %arg1: i32) -> (i32, i32) {
    %c0_i32 = arith.constant 0 : i32
    %c0_i32_0 = arith.constant 0 : i32
    %c0_i32_1 = arith.constant 0 : i32
    return %c0_i32, %c0_i32_0 : i32, i32
  }
  func.func @transform_9(%arg0: i32, %arg1: i32) -> (i32, i32) {
    %c0_i32 = arith.constant 0 : i32
    %c0_i32_0 = arith.constant 0 : i32
    %c0_i32_1 = arith.constant 0 : i32
    return %c0_i32, %c0_i32_0 : i32, i32
  }
  func.func @transform_10(%arg0: i32, %arg1: i32) -> (i32, i32, i32) {
    %c0_i32 = arith.constant 0 : i32
    %c0_i32_0 = arith.constant 0 : i32
    return %arg0, %arg1, %c0_i32 : i32, i32, i32
  }
}

</mosaic_0001>

<bundles_post_ra>
// kernel: tpu_custom_call.1
= control target key start
LH: loop header
LB: loop body
LE: loop exit
PB: predicated region body
PF: predicated region fallthrough
CT: control target
= control target key end

     0   :  { %s2393_s0 = inlined_call_operand.vmem [shape: bf16[2,64,256], index: 0, kind: input, shape index: {}]   ;;  %s2394_s1 = inlined_call_operand.vmem [shape: bf16[256,85], index: 1, kind: input, shape index: {}]   ;;  %s2395_s2 = inlined_call_operand.vmem [shape: bf16[4,16,16], index: 2, kind: input, shape index: {}]   ;;  %s2396_s3 = inlined_call_operand.vmem [shape: bf16[4,16,16], index: 3, kind: input, shape index: {}]   ;;  %s2397_s4 = inlined_call_operand.vmem [shape: bf16[4,16,16], index: 4, kind: input, shape index: {}]   ;;  %s2398_s5 = inlined_call_operand.hbm [shape: bf16[4,16,16], index: 5, kind: input, shape index: {}]   ;;  %s2399_s6 = inlined_call_operand.vmem [shape: f32[64,1], index: 6, kind: input, shape index: {}]   ;;  %s2400_s7 = inlined_call_operand.hbm [shape: bf16[4,256], index: 7, kind: input, shape index: {}]   ;;  %s2401_s8 = inlined_call_operand.hbm [shape: bf16[16,256], index: 8, kind: input, shape index: {}]   ;;  %s2402_s9 = inlined_call_operand.vmem [shape: bf16[64,256], index: 9, kind: input, shape index: {}]   ;;  %s2403_s10 = inlined_call_operand.hbm [shape: bf16[2,128,256], index: 10, kind: output, shape index: {}]  }
   0x1   :  { %2409 = sst [smem:[#allocation24_spill]] %s2400_s7 }
   0x2   :  { %15 = vsyncpa [#allocation8], 0 }
   0x3   :  { %16 = vsyncpa [#allocation11], 0 }
   0x4   :  { %17 = vsyncpa [#allocation9], 0 }
   0x5   :  { %19 = vsyncpa [#allocation9 + $0x1], 0  ;;  %s2051_s13 = smov 0   ;;  %s2053_s14 = smov 0  }
   0x6   :  { %s2055_s15 = smov 0   ;;  %s2057_s16 = smov 0  }
   0x7   :  { %s2059_s17 = smov 0   ;;  %s2061_s18 = smov 0  }
   0x8   :  { %s2063_s19 = smov 0   ;;  %s2065_s20 = smov 0  }
   0x9 LB: > { %2410 = sst [smem:[#allocation19_spill]] %s1964_s18  ;;  %s1478_s21 = sadd.s32 4294967295, %s1972_s20   ;;  %s1972_s20 = sphi %s2065_s20, %s25_s20   ;;  %s1968_s19 = sphi %s2063_s19, %s2427_s19   ;;  %s1964_s18 = sphi %s2061_s18, %s2426_s18   ;;  %s1960_s17 = sphi %s2059_s17, %s2431_s17   ;;  %s1956_s16 = sphi %s2057_s16, %s2424_s16   ;;  %s1952_s15 = sphi %s2055_s15, %s2430_s15   ;;  %s1948_s14 = sphi %s2053_s14, %s2429_s14   ;;  %s1944_s13 = sphi %s2051_s13, %s2428_s13  }
   0xa   : > { %2411 = sst [smem:[#allocation20_spill]] %s1968_s19  ;;  %s1479_s22 = sadd.s32 4294967294, %s1972_s20  }
   0xb   : > { %s34_s23 = sadd.s32 1, %s1964_s18  ;;  %s37_s24 = sadd.s32 1, %s1968_s19 }
   0xc   : > { %p35_p0 = scmp.ge.s32.totalorder %s34_s23, 8  ;;  %s267_s25 = sadd.s32 1, %s1952_s15 }
   0xd   : > { %p277_p1 = scmp.ne.s32.totalorder %s1952_s15, %s1948_s14  ;;  %p278_p2 = scmp.eq.s32.totalorder %s1478_s21, 15 }
   0xe   : > { %s2433_s23 = smov (%p35_p0, %s34_s23), 0  ;;  %s2435_s24 = smov (!%p35_p0, %s37_s24), %s1968_s19 }
   0xf   : > { %2412 = sst [smem:[#allocation21_spill]] %s2433_s23  ;;  %s263_s26 = ssub.s32 %s1964_s18, %s2433_s23 }
  0x10   : > { %p2103_p3 = por %p278_p2, %p277_p1  ;;  %p39_p4 = scmp.ge.s32.totalorder %s2435_s24, 2 }
  0x11   : > { %p283_p5 = scmp.ne.s32.totalorder %s1948_s14, %s1944_s13  ;;  %p284_p6 = scmp.eq.s32.totalorder %s1479_s22, 15 }
  0x12   : > { %p1480_p7 = scmp.ge.s32.totalorder %s1972_s20, 1  ;;  %s2437_s24 = smov (%p39_p4, %s2435_s24), 0 }
  0x13   : > { %2414 = sst [smem:[#allocation22_spill]] %s2437_s24  ;;  %p2112_p8 = por %p284_p6, %p283_p5 }
  0x14   : > { %p291_p9 = scmp.lt.s32.totalorder %s1972_s20, 17  ;;  %s262_s29 = ssub.s32 %s1968_s19, %s2437_s24 }
  0x15   : > { %s2415_s28 = scalar_select %p2112_p8, 1, 0 }
  0x16   : > { %s264_s30 = sor.u32 %s263_s26, %s262_s29  ;;  %p2119_p10 = pnand %p1480_p7, %p291_p9 }
  0x17   : > { %p265_p11 = scmp.eq.s32.totalorder %s264_s30, 0  ;;  %p2123_p12 = scmp.eq.s32.totalorder %s1478_s21, 0 }
  0x18   : > { %p1639_p13 = pneg %p2119_p10  ;;  %s1974_s26 = smov [#allocation10]  }
  0x19   : > { %s2130_s22 = scalar_select %p265_p11, %s1952_s15, %s267_s25  }
  0x1a   : > { %p2134_p0 = pnand %p2123_p12, %p1639_p13  ;;  %s332_s29 = sshll.u32 %s1974_s26, 4  ;;  %s333_s29 = int_to_ptr.vmem [resolvable:$true] %s332_s29 }
  0x1b   : > { %2418 = sst [smem:[#allocation23_spill]] %s2130_s22  ;;  %s1803_s21 = scalar_lea.vmem %s333_s29, 64 }
  0x1c   : > { %p1794_p1 = pneg %p2134_p0  ;;  %p1804_p2 = scmp.ne.s32.totalorder %s333_s29, %s1803_s21 }
  0x1d   : > { %p1811_p6 = scmp.lt.s32.totalorder %s333_s29, %s333_s29  ;;  %p1812_p7 = scmp.lt.s32.totalorder %s1803_s21, %s1803_s21 }
  0x1e   : > { %p1806_p4 = pnand %p1804_p2, %p1794_p1 }
  0x1f   : > { %p1813_p9 = por %p1812_p7, %p1811_p6 }
  0x20   : > { %p1807_p5 = pneg %p1806_p4 }
  0x22   : > { %p1814_p11 = pnand %p1813_p9, %p1807_p5 }
  0x24   : > { %1817 = shalt.err (!%p1814_p11)
}
  0x25   : > { %s2420_s7 = sld [smem:[#allocation24_spill]]  ;;  %s1975_s26 = smov [#allocation7]  }
  0x26   : > { %s315_s24 = sshll.u32 %s1975_s26, 4  ;;  %s316_s24 = int_to_ptr.vmem [resolvable:$true] %s315_s24 }
  0x27   : > { %s1829_s19 = scalar_lea.vmem %s316_s24, 512  ;;  %p1837_p8 = scmp.lt.s32.totalorder %s316_s24, %s316_s24 }
  0x28   : > { %p1830_p13 = scmp.ne.s32.totalorder %s316_s24, %s1829_s19  ;;  %p1838_p6 = scmp.lt.s32.totalorder %s1829_s19, %s1829_s19 }
  0x2a   : > { %p1832_p2 = pnand %p1830_p13, %p1794_p1  ;;  %p1839_p5 = por %p1838_p6, %p1837_p8 }
  0x2b   : > { %1645 = dma.hbm_to_vmem [thread:$0]  (!%p2134_p0), %s2420_s7, 64, %s333_s29, [#allocation11]  }
  0x2c   : > { %p1833_p4 = pneg %p1832_p2 }
  0x2e   : > { %p1840_p7 = pnand %p1839_p5, %p1833_p4 }
  0x30   : > { %1843 = shalt.err (!%p1840_p7)
}
  0x31   : > { %s1976_s21 = smov 64   ;;  %s1977_s25 = smov 4  }
  0x32   : > { %1642 = dma.hbm_to_vmem [thread:$0]  (!%p2134_p0), %s2398_s5, 512, %s316_s24, [#allocation8], %s1976_s21, %s1976_s21, %s1977_s25  }
  0x33   : > { %s1978_s26 = smov [#allocation12]  }
  0x34   : > { %s342_s7 = sshll.u32 %s1978_s26, 4  ;;  %s343_s7 = int_to_ptr.vmem [resolvable:$true] %s342_s7 }
  0x35   : > { %s1855_s18 = scalar_lea.vmem %s343_s7, 256  ;;  %p1863_p13 = scmp.lt.s32.totalorder %s343_s7, %s343_s7 }
  0x36   : > { %p1856_p9 = scmp.ne.s32.totalorder %s343_s7, %s1855_s18  ;;  %p1864_p2 = scmp.lt.s32.totalorder %s1855_s18, %s1855_s18 }
  0x38   : > { %p1858_p11 = pnand %p1856_p9, %p1794_p1  ;;  %p1865_p4 = por %p1864_p2, %p1863_p13 }
  0x3a   : > { %p1859_p8 = pneg %p1858_p11 }
  0x3c   : > { %p1866_p6 = pnand %p1865_p4, %p1859_p8 }
  0x3e   : > { %1869 = shalt.err (!%p1866_p6)
}
  0x3f   : > { %s1979_s19 = smov 128   ;;  %s1980_s22 = smov 8  }
  0x40   : > { %1648 = dma.hbm_to_vmem [thread:$0]  (!%p2134_p0), %s2401_s8, 256, %s343_s7, [#allocation11], %s1979_s19, %s1979_s19, %s1980_s22  }
  0x41   : > { %379 = sbr.rel (%p2119_p10) target bundleno = 1887 (0x75f), region = 60 }
  0x46   : > { %1929 = dma.done.wait (%p2123_p12), [#allocation8], 512  }
  0x47   : > { %1931 = vsyncadd (%p2123_p12), [#allocation8], 4294966784 }
  0x48   : > { %1933 = dma.done.wait (%p2123_p12), [#allocation11], 320  }
  0x49   : > { %1935 = vsyncadd (%p2123_p12), [#allocation11], 4294966976  ;;  %s2408_s7 = sand.u32 1, %s1948_s14   ;;  %p432_p10 = scmp.lt.s32.totalorder %s1956_s16, 3 }
  0x4a   : > { %s1489_s18 = sshll.u32 %s2408_s7, 4  ;;  %p435_p0 = scmp.lt.s32.totalorder %s1960_s17, 1 }
  0x4b   : > { %s433_s23 = scalar_select %p432_p10, %s1956_s16, 3 }
  0x4c   : > { %s436_s11 = scalar_select %p435_p0, %s1960_s17, 1 }
  0x4d   : > { %s1490_s22 = sshll.u32 %s433_s23, 1  ;;  %s2186_s24 = scalar_lea.vmem [#allocation13], %s1489_s18 }
  0x4e   : > { %p437_p1 = scmp.lt.s32.totalorder %s1490_s22, 7  ;;  %s1492_s21 = sshll.u32 %s436_s11, 4 }
  0x4f   : > { %p1494_p12 = scmp.ne.s32.totalorder %s1956_s16, 0 }
  0x50   : > { %s2439_s22 = smov (!%p437_p1, %s1490_s22), 7 }
  0x51   : > { %s1491_s25 = sshll.u32 %s2439_s22, 1  ;;  %452 = sbr.rel (%p1494_p12) target bundleno = 91 (0x5b), region = 76 }
  0x52   : > { %s441_s12 = sadd.s32 %s1492_s21, %s1491_s25 }
  0x53   : > { %s1493_s30 = sshll.u32 %s441_s12, 2 }
  0x54   : > { %s2184_s29 = scalar_lea.vmem %s2393_s0, %s1493_s30 }
  0x56   : > { %vm453_vm0 = vcmask 7168   ;;  %vm456_vm1 = vcmask 31744   ;;  %vm459_vm2 = vcmask 130048   ;;  %v1981_v0 = vmov 0.0  }
  0x57   : > { %454 = vst.msk [vmem:[#allocation2] sm:$0xff] %vm453_vm0, %v1981_v0  ;;  %455 = vst.msk [vmem:[#allocation2 + $0x8] sm:$0xff] %vm453_vm0, %v1981_v0  ;;  %vm462_vm3 = vcmask 523264  }
  0x58   : > { %457 = vst.msk [vmem:[#allocation3] sm:$0xff] %vm456_vm1, %v1981_v0  ;;  %458 = vst.msk [vmem:[#allocation3 + $0x8] sm:$0xff] %vm456_vm1, %v1981_v0 }
  0x59   : > { %460 = vst.msk [vmem:[#allocation4] sm:$0xff] %vm459_vm2, %v1981_v0  ;;  %461 = vst.msk [vmem:[#allocation4 + $0x8] sm:$0xff] %vm459_vm2, %v1981_v0 }
  0x5a   : > { %463 = vst.msk [vmem:[#allocation5] sm:$0xff] %vm462_vm3, %v1981_v0  ;;  %464 = vst.msk [vmem:[#allocation5 + $0x8] sm:$0xff] %vm462_vm3, %v1981_v0 }
  0x5b PF: > { %p1495_p5 = scmp.ge.s32.totalorder %s1956_s16, 4 }
  0x5d   : > { %468 = sbr.rel (%p1495_p5) target bundleno = 680 (0x2a8), region = 80 }
  0x62   : > { %v502_v1 = vld [vmem:[%s2184_s29] sm:$0xff]  ;;  %v504_v2 = vld [vmem:[%s2184_s29 + $0x8] sm:$0xff] }
  0x63   : > { %503 = vst [vmem:[%s2186_s24] sm:$0xff] %v502_v1  ;;  %505 = vst [vmem:[%s2186_s24 + $0x8] sm:$0xff] %v504_v2 }
  0x64   : > { %513 = vsyncadd [#allocation6], 256  ;;  %v1745_v3 = vld [vmem:[%s2394_s1 + $0x78] sm:$0xff]   ;;  %v1747_v5 = vld [vmem:[%s2394_s1 + $0x70] sm:$0xff]   ;;  %v1982_v21 = vmov 0.0   ;;  %s2245_s11 = sshll.u32 %s1956_s16, 3 }
  0x65   : > { %v1746_v4 = vld [vmem:[%s2394_s1 + $0x38] sm:$0xff]   ;;  %1571 = vmatprep.subr.bf16.mxu0 %v1745_v3  ;;  %v1748_v6 = vld [vmem:[%s2394_s1 + $0x30] sm:$0xff]   ;;  %v1749_v7 = vld [vmem:[%s2394_s1 + $0x68] sm:$0xff]   ;;  %1601 = vmatprep.subr.bf16.mxu1 %v1982_v21  ;;  %s698_s25 = scalar_lea.vmem %s2395_s2, %s2245_s11  ;;  %vm1983_vm4 = vmmov 0   ;;  %s763_s30 = scalar_lea.vmem %s2396_s3, %s2245_s11  ;;  %vm712_vm5 = vcmask 130048   ;;  %vm759_vm6 = vcmask 7168  }
  0x66   : > { %1572 = vmatpush3.bf16.msra.mxu0 %v1746_v4  ;;  %v1750_v8 = vld [vmem:[%s2394_s1 + $0x28] sm:$0xff]   ;;  %v1751_v9 = vld [vmem:[%s2394_s1 + $0x60] sm:$0xff]   ;;  %v1753_v11 = vld [vmem:[%s2394_s1 + $0x58] sm:$0xff]   ;;  %1603 = vmatprep.mubr.msk.bf16.mxu1 %vm1983_vm4, %v1982_v21  ;;  %s1984_s26 = smov 64   ;;  %s1985_s19 = smov 44   ;;  %vm822_vm7 = vcmask 31744  }
  0x67   : > { %1573 = vmatprep.subr.bf16.mxu0 %v1747_v5  ;;  %v1752_v10 = vld [vmem:[%s2394_s1 + $0x20] sm:$0xff]   ;;  %v1754_v12 = vld [vmem:[%s2394_s1 + $0x18] sm:$0xff]   ;;  %v1755_v13 = vld [vmem:[%s2394_s1 + $0x50] sm:$0xff]   ;;  %s826_s22 = scalar_lea.vmem %s2397_s4, %s2245_s11  ;;  %s1986_s21 = smov 48   ;;  %vm944_vm8 = vcmask 523264  }
  0x68   : > { %v1763_v14 = vld [vmem:[%s2184_s29 + $0x4] ss:$8 sps:$4 sm:$0xff]   ;;  %v1756_v15 = vld [vmem:[%s2394_s1 + $0x10] sm:$0xff]   ;;  %v1761_v20 = vld [vmem:[%s2184_s29] ss:$8 sps:$4 sm:$0xff]   ;;  %s888_s7 = scalar_lea.vmem [#allocation7], %s2245_s11 }
  0x69   : > { %686 = vmatprep.mubr.bf16.mxu0 %v1763_v14  ;;  %v1757_v16 = vld [vmem:[%s2394_s1 + $0x48] sm:$0xff]   ;;  %v1759_v18 = vld [vmem:[%s2394_s1 + $0x40] sm:$0xff]   ;;  %v766_v44 = vld [vmem:[#allocation3] sm:$0xff] }
  0x6a   : > { %1574 = vmatpush3.bf16.msra.mxu0 %v1748_v6  ;;  %v1758_v17 = vld [vmem:[%s2394_s1 + $0x8] sm:$0xff]   ;;  %v1760_v19 = vld [vmem:[%s2394_s1] sm:$0xff]   ;;  %v767_v48 = vld [vmem:[#allocation3 + $0x8] sm:$0xff] }
  0x6b   : > { %1575 = vmatprep.subr.bf16.mxu0 %v1749_v7  ;;  %v1764_v30 = vld [vmem:[%s698_s25] sm:$0xff]   ;;  %v702_v40 = vld [vmem:[#allocation2 + $0x8] sm:$0xff]  ;;  %v891_v60 = vld [vmem:[#allocation5] sm:$0xff] }
  0x6c   : > { %v1765_v32 = vld [vmem:[%s763_s30] sm:$0xff]   ;;  %v830_v56 = vld [vmem:[#allocation4 + $0x8] sm:$0xff]  ;;  %v892_v0 = vld [vmem:[#allocation5 + $0x8] sm:$0xff] }
  0x6d   : > { %v1766_v34 = vld [vmem:[%s826_s22] sm:$0xff]  }
  0x6e   : > { %1576 = vmatpush3.bf16.msra.mxu0 %v1750_v8  ;;  %v1767_v35 = vld [vmem:[%s888_s7] sm:$0xff]  }
  0x6f   : > { %1577 = vmatprep.subr.bf16.mxu0 %v1751_v9  ;;  %v701_v36 = vld [vmem:[#allocation2] sm:$0xff] }
  0x70   : > { %v829_v52 = vld [vmem:[#allocation4] sm:$0xff] }
  0x72   : > { %1578 = vmatpush3.bf16.msra.mxu0 %v1752_v10 }
  0x73   : > { %1579 = vmatprep.subr.bf16.mxu0 %v1753_v11 }
  0x76   : > { %1580 = vmatpush3.bf16.msra.mxu0 %v1754_v12 }
  0x77   : > { %1581 = vmatprep.subr.bf16.mxu0 %v1755_v13 }
  0x7a   : > { %1582 = vmatpush3.bf16.msra.mxu0 %v1756_v15 }
  0x7b   : > { %1583 = vmatprep.subr.bf16.mxu0 %v1757_v16 }
  0x7e   : > { %1584 = vmatpush3.bf16.msra.mxu0 %v1758_v17 }
  0x7f   : > { %1585 = vmatprep.subr.bf16.mxu0 %v1759_v18 }
  0x82   : > { %1586 = vmatpush3.bf16.msra.mxu0 %v1760_v19 }
  0x85   : > { %687 = vmatmul.mubr.bf16.vlgmr.msra.gmra.mxu0 %v1761_v20 }
 0x145   : > { %v1587_v22 = vpop.f32.mrf.mxu0 }
 0x147   : > { %v1588_v23 = vpop.f32.mrf.mxu0 }
 0x148   : > { %v1589_v26 = vadd.f32 %v1588_v23, %v1587_v22 }
 0x149   : > { %v1590_v24 = vpop.f32.mrf.mxu0 }
 0x14b   : > { %v1591_v25 = vpop.f32.mrf.mxu0 }
 0x14c   : > { %v1592_v27 = vadd.f32 %v1591_v25, %v1590_v24 }
 0x14e   : > { %v695_v28 = vpack.c.bf16 %v1592_v27, %v1589_v26 }
 0x150   : > { %836 = vrot.lane.b32.xlu1 %v695_v28, %s1984_s26  ;;  %709 = vrot.lane.b32.xlu0 %v695_v28, %s1985_s19 }
 0x154   : > { %773 = vrot.lane.b32.xlu0 %v695_v28, %s1986_s21 }
 0x1c2   : > { %v710_v29 = vpop.permute.xlu0 %709  ;;  %v837_v33 = vpop.permute.xlu1 %836 }
 0x1c3   : > { %1602 = vmatpush3.bf16.msra.mxu1 %v710_v29 }
 0x1c4   : > { %1607 = vmatprep.subr.bf16.mxu1 %v1982_v21 }
 0x1c6   : > { %1604 = vmatmul.mubr.msk.bf16.vlgmr.msra.gmra.mxu1 %vm712_vm5, %v1764_v30  ;;  %v774_v31 = vpop.permute.xlu0 %773 }
 0x1c7   : > { %1608 = vmatpush3.bf16.msra.mxu1 %v774_v31  ;;  %1609 = vmatprep.mubr.msk.bf16.mxu1 %vm1983_vm4, %v1982_v21 }
 0x1c8   : > { %1613 = vmatprep.subr.bf16.mxu1 %v1982_v21 }
 0x1ce   : > { %1610 = vmatmul.mubr.msk.bf16.vlgmr.msra.gmra.mxu1 %vm712_vm5, %v1765_v32 }
 0x1cf   : > { %1614 = vmatpush3.bf16.msra.mxu1 %v837_v33  ;;  %1615 = vmatprep.mubr.msk.bf16.mxu1 %vm1983_vm4, %v1982_v21 }
 0x1d0   : > { %1619 = vmatprep.subr.bf16.mxu1 %v1982_v21 }
 0x1d6   : > { %1616 = vmatmul.mubr.msk.bf16.vlgmr.msra.gmra.mxu1 %vm712_vm5, %v1766_v34 }
 0x1d7   : > { %1620 = vmatpush3.bf16.msra.mxu1 %v695_v28  ;;  %1621 = vmatprep.mubr.msk.bf16.mxu1 %vm1983_vm4, %v1982_v21 }
 0x1de   : > { %1622 = vmatmul.mubr.msk.bf16.vlgmr.msra.gmra.mxu1 %vm712_vm5, %v1767_v35 }
 0x286   : > { %v750_v37 = vpop.f32.mrf.mxu1 }
 0x287   : > { %v757_v38 = vadd.f32 %v750_v37, %v701_v36 }
 0x288   : > { %v1605_v39 = vpop.f32.mrf.mxu1 }
 0x289   : > { %760 = vst.msk [vmem:[#allocation2] sm:$0xff] %vm759_vm6, %v757_v38 }
 0x28a   : > { %v753_v41 = vpop.f32.mrf.mxu1 }
 0x28b   : > { %v758_v42 = vadd.f32 %v753_v41, %v702_v40 }
 0x28c   : > { %v1606_v43 = vpop.f32.mrf.mxu1 }
 0x28d   : > { %761 = vst.msk [vmem:[#allocation2 + $0x8] sm:$0xff] %vm759_vm6, %v758_v42 }
 0x28e   : > { %v813_v45 = vpop.f32.mrf.mxu1 }
 0x28f   : > { %v820_v46 = vadd.f32 %v813_v45, %v766_v44 }
 0x290   : > { %v1611_v47 = vpop.f32.mrf.mxu1 }
 0x291   : > { %823 = vst.msk [vmem:[#allocation3] sm:$0xff] %vm822_vm7, %v820_v46 }
 0x292   : > { %v816_v49 = vpop.f32.mrf.mxu1 }
 0x293   : > { %v821_v50 = vadd.f32 %v816_v49, %v767_v48 }
 0x294   : > { %v1612_v51 = vpop.f32.mrf.mxu1 }
 0x295   : > { %824 = vst.msk [vmem:[#allocation3 + $0x8] sm:$0xff] %vm822_vm7, %v821_v50 }
 0x296   : > { %v876_v53 = vpop.f32.mrf.mxu1 }
 0x297   : > { %v883_v54 = vadd.f32 %v876_v53, %v829_v52 }
 0x298   : > { %v1617_v55 = vpop.f32.mrf.mxu1 }
 0x299   : > { %885 = vst.msk [vmem:[#allocation4] sm:$0xff] %vm712_vm5, %v883_v54 }
 0x29a   : > { %v879_v57 = vpop.f32.mrf.mxu1 }
 0x29b   : > { %v884_v58 = vadd.f32 %v879_v57, %v830_v56 }
 0x29c   : > { %v1618_v59 = vpop.f32.mrf.mxu1 }
 0x29d   : > { %886 = vst.msk [vmem:[#allocation4 + $0x8] sm:$0xff] %vm712_vm5, %v884_v58 }
 0x29e   : > { %v935_v61 = vpop.f32.mrf.mxu1 }
 0x29f   : > { %v942_v62 = vadd.f32 %v935_v61, %v891_v60 }
 0x2a0   : > { %v1623_v63 = vpop.f32.mrf.mxu1 }
 0x2a1   : > { %945 = vst.msk [vmem:[#allocation5] sm:$0xff] %vm944_vm8, %v942_v62 }
 0x2a2   : > { %v938_v1 = vpop.f32.mrf.mxu1 }
 0x2a3   : > { %v943_v2 = vadd.f32 %v938_v1, %v892_v0 }
 0x2a4   : > { %v1624_v3 = vpop.f32.mrf.mxu1 }
 0x2a5   : > { %946 = vst.msk [vmem:[#allocation5 + $0x8] sm:$0xff] %vm944_vm8, %v943_v2 }
 0x2a6   : > { %1936 = dma.done.wait [#allocation6], 256 }
 0x2a7   : > { %1937 = vsyncadd [#allocation6], 4294967040 }
 0x2a8 PF: > { %p1527_p7 = scmp.ne.s32.totalorder %s1956_s16, 4 }
 0x2aa   : > { %955 = sbr.rel (%p1527_p7) target bundleno = 826 (0x33a), region = 118 }
 0x2af   : > { %v956_v4 = vld [vmem:[#allocation2] sm:$0xff]  ;;  %v957_v5 = vld [vmem:[#allocation2 + $0x8] sm:$0xff]  ;;  %v1987_v7 = vmov 0   ;;  %v1988_v14 = vmov 839922192   ;;  %v979_v16 = vlaneseq }
 0x2b0   : > { %v958_v6 = vld [vmem:[%s2399_s6] sm:$0xff]  ;;  %1768 = vset.pattern.permute.xlu0 %v1987_v7  ;;  %v959_v8 = vld [vmem:[%s2399_s6 + $0x8] sm:$0xff]  ;;  %v977_v15 = vunpack.c.l.s4 %v1988_v14  ;;  %v1989_v17 = vmov 1985246804  }
 0x2b1   : > { %v960_v9 = vadd.f32 %v958_v6, %v956_v4  ;;  %v961_v10 = vadd.f32 %v959_v8, %v957_v5  ;;  %v984_v18 = vunpack.c.l.s4 %v1989_v17  ;;  %v980_v20 = vshrl.u32 %v979_v16, 7 }
 0x2b2   : > { %v978_v19 = vunpack.c.0.s8 %v977_v15 }
 0x2b3   : > { %v962_v11 = vmax.f32 %v960_v9, 0.0  ;;  %v963_v12 = vmax.f32 %v961_v10, 0.0  ;;  %v985_v21 = vunpack.c.0.s8 %v984_v18 }
 0x2b4   : > { %v981_v23 = vsub.s32 %v978_v19, %v980_v20 }
 0x2b5   : > { %v1769_v13 = vpack.i.bf16 %v963_v12, %v962_v11  ;;  %v988_v24 = vsub.s32 %v985_v21, %v980_v20 }
 0x2b7   : > { %1770 = vperm.xlu0 %1768, %v1769_v13  }
 0x332   : > { %v1771_v22 = vpop.permute.xlu0 %1770 }
 0x333   : > { %v1773_v25 = vunpack.i.h.bf16 %v1771_v22  ;;  %v1772_v26 = vunpack.i.l.bf16 %v1771_v22 }
 0x335   : > { %v974_v27 = vpack.c.bf16 %v1773_v25, %v1772_v26 }
 0x337   : > { %v982_v28 = vrot.slane %v974_v27, %v981_v23  ;;  %v989_v29 = vrot.slane %v974_v27, %v988_v24 }
 0x339   : > { %992 = vst [vmem:[%s2186_s24] sm:$0xff] %v982_v28  ;;  %993 = vst [vmem:[%s2186_s24 + $0x8] sm:$0xff] %v989_v29 }
 0x33a PF: > { %p1528_p9 = scmp.ne.s32.totalorder %s1956_s16, 5 }
 0x33c   : > { %997 = sbr.rel (%p1528_p9) target bundleno = 1171 (0x493), region = 122 }
 0x341   : > { %v1000_v30 = vld [vmem:[%s2399_s6 + $0x10] sm:$0xff]  ;;  %v1990_v31 = vmov 0   ;;  %v1529_v32 = vld.sshfl [vmem:[#allocation10] sm:$0x33 pattern:$0x76325410] }
 0x342   : > { %1774 = vset.pattern.permute.xlu0 %v1990_v31  ;;  %1070 = vmatprep.mubr.bf16.mxu0 %v1990_v31  ;;  %v1026_v33 = vcombine.high %v1529_v32, %v1529_v32  ;;  %v1001_v34 = vld [vmem:[%s2399_s6 + $0x18] sm:$0xff]  ;;  %vm1031_vm9 = vcmask 1041408   ;;  %v998_v37 = vld [vmem:[#allocation3] sm:$0xff]  ;;  %vm1027_vm10 = vcmask 31744  }
 0x343   : > { %1004 = vperm.xlu0 %1774, %v1000_v30   ;;  %v1033_v35 = vsel %vm1031_vm9, %v1529_v32, 0  ;;  %v999_v38 = vld [vmem:[#allocation3 + $0x8] sm:$0xff] }
 0x344   : > { %1530 = vmatprep.subr.msk.bf16.mxu0 %vm1031_vm9, %v1026_v33 }
 0x345   : > { %1053 = vmatpush1.bf16.msra.mxu0 %v1033_v35 }
 0x347   : > { %1009 = vperm.xlu0 %1774, %v1001_v34  }
 0x3be   : > { %v1005_v36 = vpop.permute.xlu0 %1004 }
 0x3bf   : > { %v1012_v39 = vadd.f32 %v1005_v36, %v998_v37 }
 0x3c1   : > { %v1014_v42 = vmax.f32 %v1012_v39, 0.0 }
 0x3c2   : > { %v1010_v40 = vpop.permute.xlu0 %1009 }
 0x3c3   : > { %v1013_v41 = vadd.f32 %v1010_v40, %v999_v38 }
 0x3c5   : > { %v1015_v43 = vmax.f32 %v1013_v41, 0.0 }
 0x3c7   : > { %v1017_v44 = vpack.c.bf16 %v1015_v43, %v1014_v42 }
 0x3c9   : > { %1531 = vmatmul.mubr.msk.bf16.vlgmr.msra.gmra.mxu0 %vm1027_vm10, %v1017_v44 }
 0x489   : > { %v1072_v45 = vpop.f32.mrf.mxu0 }
 0x48b   : > { %v1074_v46 = vpop.f32.mrf.mxu0 }
 0x48c   : > { %v1564_v47 = vpack.c.bf16 %v1074_v46, %v1072_v45 }
 0x48d   : > { %v1076_v48 = vpop.f32.mrf.mxu0 }
 0x48e   : > { %1093 = vst [vmem:[%s2186_s24] sm:$0xff] %v1564_v47 }
 0x48f   : > { %v1078_v49 = vpop.f32.mrf.mxu0 }
 0x490   : > { %v1565_v50 = vpack.c.bf16 %v1078_v49, %v1076_v48 }
 0x492   : > { %1094 = vst [vmem:[%s2186_s24 + $0x8] sm:$0xff] %v1565_v50 }
 0x493 PF: > { %p1534_p11 = scmp.ne.s32.totalorder %s1956_s16, 6 }
 0x495   : > { %1098 = sbr.rel (%p1534_p11) target bundleno = 1516 (0x5ec), region = 126 }
 0x49a   : > { %v1101_v51 = vld [vmem:[%s2399_s6 + $0x20] sm:$0xff]  ;;  %v1991_v52 = vmov 0   ;;  %v1776_v53 = vld [vmem:[#allocation12 + $0x4] ss:$8 sps:$4 sm:$0xff]   ;;  %vm1130_vm11 = vcmask 130048  }
 0x49b   : > { %1775 = vset.pattern.permute.xlu0 %v1991_v52  ;;  %1166 = vmatprep.mubr.bf16.mxu0 %v1991_v52  ;;  %v1102_v54 = vld [vmem:[%s2399_s6 + $0x28] sm:$0xff]  ;;  %v1099_v57 = vld [vmem:[#allocation4] sm:$0xff] }
 0x49c   : > { %1105 = vperm.xlu0 %1775, %v1101_v51   ;;  %v1778_v55 = vld [vmem:[#allocation12] ss:$8 sps:$4 sm:$0xff]   ;;  %1148 = vmatprep.subr.bf16.mxu0 %v1776_v53 }
 0x49d   : > { %1149 = vmatpush1.bf16.msra.mxu0 %v1778_v55  ;;  %v1100_v58 = vld [vmem:[#allocation4 + $0x8] sm:$0xff] }
 0x4a0   : > { %1110 = vperm.xlu0 %1775, %v1102_v54  }
 0x517   : > { %v1106_v56 = vpop.permute.xlu0 %1105 }
 0x518   : > { %v1113_v59 = vadd.f32 %v1106_v56, %v1099_v57 }
 0x51a   : > { %v1115_v62 = vmax.f32 %v1113_v59, 0.0 }
 0x51b   : > { %v1111_v60 = vpop.permute.xlu0 %1110 }
 0x51c   : > { %v1114_v61 = vadd.f32 %v1111_v60, %v1100_v58 }
 0x51e   : > { %v1116_v63 = vmax.f32 %v1114_v61, 0.0 }
 0x520   : > { %v1119_v0 = vpack.c.bf16 %v1116_v63, %v1115_v62 }
 0x522   : > { %1537 = vmatmul.mubr.msk.bf16.vlgmr.msra.gmra.mxu0 %vm1130_vm11, %v1119_v0 }
 0x5e2   : > { %v1168_v1 = vpop.f32.mrf.mxu0 }
 0x5e4   : > { %v1170_v2 = vpop.f32.mrf.mxu0 }
 0x5e5   : > { %v1566_v3 = vpack.c.bf16 %v1170_v2, %v1168_v1 }
 0x5e6   : > { %v1172_v4 = vpop.f32.mrf.mxu0 }
 0x5e7   : > { %1189 = vst [vmem:[%s2186_s24] sm:$0xff] %v1566_v3 }
 0x5e8   : > { %v1174_v5 = vpop.f32.mrf.mxu0 }
 0x5e9   : > { %v1567_v6 = vpack.c.bf16 %v1174_v5, %v1172_v4 }
 0x5eb   : > { %1190 = vst [vmem:[%s2186_s24 + $0x8] sm:$0xff] %v1567_v6 }
 0x5ec PF: > { %p1540_p8 = scmp.ne.s32.totalorder %s1956_s16, 7 }
 0x5ee   : > { %1194 = sbr.rel (%p1540_p8) target bundleno = 1861 (0x745), region = 130 }
 0x5f3   : > { %v1197_v7 = vld [vmem:[%s2399_s6 + $0x30] sm:$0xff]  ;;  %v1992_v8 = vmov 0   ;;  %v1783_v11 = vld [vmem:[%s2402_s9 + $0x24] ss:$8 sps:$4 sm:$0xff]   ;;  %v1198_v12 = vld [vmem:[%s2399_s6 + $0x38] sm:$0xff]  ;;  %vm1262_vm12 = vcmask 523264  }
 0x5f4   : > { %1779 = vset.pattern.permute.xlu0 %v1992_v8  ;;  %v1780_v9 = vld [vmem:[%s2402_s9 + $0x34] ss:$8 sps:$4 sm:$0xff]   ;;  %v1782_v10 = vld [vmem:[%s2402_s9 + $0x30] ss:$8 sps:$4 sm:$0xff]   ;;  %1298 = vmatprep.mubr.bf16.mxu0 %v1992_v8  ;;  %v1785_v13 = vld [vmem:[%s2402_s9 + $0x20] ss:$8 sps:$4 sm:$0xff]  }
 0x5f5   : > { %1201 = vperm.xlu0 %1779, %v1197_v7   ;;  %1274 = vmatprep.subr.bf16.mxu0 %v1780_v9  ;;  %v1786_v14 = vld [vmem:[%s2402_s9 + $0x14] ss:$8 sps:$4 sm:$0xff]   ;;  %v1788_v15 = vld [vmem:[%s2402_s9 + $0x10] ss:$8 sps:$4 sm:$0xff]   ;;  %v1789_v16 = vld [vmem:[%s2402_s9 + $0x4] ss:$8 sps:$4 sm:$0xff]  }
 0x5f6   : > { %1275 = vmatpush1.bf16.msra.mxu0 %v1782_v10  ;;  %v1791_v17 = vld [vmem:[%s2402_s9] ss:$8 sps:$4 sm:$0xff]   ;;  %v1195_v19 = vld [vmem:[#allocation5] sm:$0xff]  ;;  %v1196_v20 = vld [vmem:[#allocation5 + $0x8] sm:$0xff] }
 0x5f7   : > { %1276 = vmatprep.subr.bf16.mxu0 %v1783_v11 }
 0x5f9   : > { %1206 = vperm.xlu0 %1779, %v1198_v12  }
 0x5fa   : > { %1277 = vmatpush1.bf16.msra.mxu0 %v1785_v13 }
 0x5fb   : > { %1278 = vmatprep.subr.bf16.mxu0 %v1786_v14 }
 0x5fe   : > { %1279 = vmatpush1.bf16.msra.mxu0 %v1788_v15 }
 0x5ff   : > { %1280 = vmatprep.subr.bf16.mxu0 %v1789_v16 }
 0x602   : > { %1281 = vmatpush1.bf16.msra.mxu0 %v1791_v17 }
 0x670   : > { %v1202_v18 = vpop.permute.xlu0 %1201 }
 0x671   : > { %v1209_v21 = vadd.f32 %v1202_v18, %v1195_v19 }
 0x673   : > { %v1211_v24 = vmax.f32 %v1209_v21, 0.0 }
 0x674   : > { %v1207_v22 = vpop.permute.xlu0 %1206 }
 0x675   : > { %v1210_v23 = vadd.f32 %v1207_v22, %v1196_v20 }
 0x677   : > { %v1212_v25 = vmax.f32 %v1210_v23, 0.0 }
 0x679   : > { %v1221_v26 = vpack.c.bf16 %v1212_v25, %v1211_v24 }
 0x67b   : > { %1549 = vmatmul.mubr.msk.bf16.vlgmr.msra.gmra.mxu0 %vm1262_vm12, %v1221_v26 }
 0x73b   : > { %v1300_v27 = vpop.f32.mrf.mxu0 }
 0x73d   : > { %v1302_v28 = vpop.f32.mrf.mxu0 }
 0x73e   : > { %v1568_v29 = vpack.c.bf16 %v1302_v28, %v1300_v27 }
 0x73f   : > { %v1304_v30 = vpop.f32.mrf.mxu0 }
 0x740   : > { %1321 = vst [vmem:[%s2186_s24] sm:$0xff] %v1568_v29 }
 0x741   : > { %v1306_v31 = vpop.f32.mrf.mxu0 }
 0x742   : > { %v1569_v32 = vpack.c.bf16 %v1306_v31, %v1304_v30 }
 0x744   : > { %1322 = vst [vmem:[%s2186_s24 + $0x8] sm:$0xff] %v1569_v32 }
 0x745 PF: > { %s1570_s18 = sshll.u32 %s1956_s16, 2  ;;  %s1555_s23 = sshll.u32 %s1960_s17, 5 }
 0x746   : > { %s1340_s22 = sshll.u32 %s2186_s24, 4  ;;  %s1337_s21 = sadd.s32 %s1570_s18, %s1555_s23  ;;  %s2333_s22 = int_to_ptr.vmem [resolvable:$true] %s1340_s22 }
 0x747   : > { %s1556_s7 = sshll.u32 %s1337_s21, 6  ;;  %s2421_s12 = sand.u32 1, %s1948_s14  }
 0x748   : > { %s2338_s29 = scalar_lea.hbm %s2403_s10, %s1556_s7  ;;  %s2342_s30 = scalar_lea.sflag [#allocation9], %s2421_s12 }
 0x749   : > { %s1870_s26 = scalar_lea.vmem %s2333_s22, 256  ;;  %s1993_s16 = smov [#allocation13]  }
 0x74a   : > { %p1871_p13 = scmp.ne.s32.totalorder %s2333_s22, %s1870_s26  ;;  %s1874_s17 = sshll.u32 %s1993_s16, 4  ;;  %s1875_s17 = int_to_ptr.vmem [resolvable:$false] %s1874_s17 }
 0x74b   : > { %s1876_s24 = scalar_lea.vmem %s1875_s17, 512  ;;  %p1877_p6 = scmp.lt.s32.totalorder %s2333_s22, %s1875_s17 }
 0x74c   : > { %p1872_p2 = pnand %p1871_p13, %p2103_p3  ;;  %p1878_p10 = scmp.lt.s32.totalorder %s1876_s24, %s1870_s26 }
 0x74e   : > { %p1873_p4 = pneg %p1872_p2  ;;  %p1879_p0 = por %p1878_p10, %p1877_p6 }
 0x750   : > { %p1880_p1 = pnand %p1879_p0, %p1873_p4 }
 0x752   : > { %1883 = shalt.err (!%p1880_p1)
}
 0x753   : > { %s1884_s19 = scalar_lea.hbm %s2338_s29, 256  ;;  %s1888_s21 = scalar_lea.hbm %s2403_s10, 4096 }
 0x754   : > { %p1885_p12 = scmp.ne.s32.totalorder %s2338_s29, %s1884_s19  ;;  %p1889_p9 = scmp.lt.s32.totalorder %s2338_s29, %s2403_s10 }
 0x755   : > { %p1890_p11 = scmp.lt.s32.totalorder %s1888_s21, %s1884_s19 }
 0x756   : > { %p1886_p5 = pnand %p1885_p12, %p2103_p3 }
 0x757   : > { %p1891_p8 = por %p1890_p11, %p1889_p9 }
 0x758   : > { %p1887_p7 = pneg %p1886_p5 }
 0x75a   : > { %p1892_p13 = pnand %p1891_p8, %p1887_p7 }
 0x75c   : > { %1895 = shalt.err (!%p1892_p13)
}
 0x75d   : > { %s1994_s25 = smov 128   ;;  %s1995_s12 = smov 8  }
 0x75e   : > { %1637 = dma.vmem_to_hbm [thread:$0]  (%p2103_p3), %s2333_s22, 256, %s2338_s29, %s2342_s30, %s1994_s25, %s1994_s25, %s1995_s12  }
 0x75f PF: > { %p1659_p2 = scmp.ge.s32.totalorder %s1972_s20, 2  ;;  %s1355_s26 = sand.u32 1, %s1944_s13  }
 0x760   : > { %p2422_p4 = scmp.ne.s32.totalorder %s2415_s28, 0  ;;  %s1356_s16 = scalar_lea.sflag [#allocation9], %s1355_s26 }
 0x762   : > { %p1650_p6 = pnand %p1659_p2, %p2422_p4 }
 0x764   : > { %p1651_p10 = pneg %p1650_p6 }
 0x766   : > { %1939 = dma.done.wait (%p1651_p10), %s1356_s16, 256  }
 0x767   : > { %1941 = vsyncadd (%p1651_p10), %s1356_s16, 4294967040  ;;  %s25_s20 = sadd.s32 1, %s1972_s20   ;;  %s2423_s17 = sld [smem:[#allocation23_spill]] }
 0x768   : > { %p22_p0 = scmp.ge.s32.totalorder %s25_s20, 18   ;;  %s2424_s16 = sld [smem:[#allocation19_spill]] }
 0x769   : > { %s2425_s27 = sld [smem:[#allocation20_spill]]  ;;  %s2428_s13 = smov %s1948_s14 }
 0x76a   : > { %s2426_s18 = sld [smem:[#allocation21_spill]]  ;;  %s2429_s14 = smov %s1952_s15 }
 0x76b   : > { %s2427_s19 = sld [smem:[#allocation22_spill]]  ;;  %24 = sbr.rel (!%p22_p0) target bundleno = 9 (0x9), region = 178 }
 0x76d   : > { %s2430_s15 = smov %s2423_s17 }
 0x76f   : > { %s2431_s17 = smov %s2425_s27 }
 0x770   :  { %1361 = vsyncpa [#allocation8], 1 }
 0x771   :  { %1363 = vsyncpa [#allocation8 + $0x1], 1 }
 0x772   :  { %1364 = vsyncpa [#allocation11], 1 }
 0x773   :  { %1365 = vsyncpa [#allocation9], 1 }
 0x774   :  { %1367 = vsyncpa [#allocation9 + $0x1], 1 }
 0x775   :  { %1368 = vsyncmov [#allocation6] }
 0x778   :  { %s1369_s28 = vpop.sfrf %1368 }
 0x779   :  { %p1559_p3 = scmp.ne.s32.totalorder %s1369_s28, 0 }
 0x77b   :  { %1373 = shalt.err (%p1559_p3)  }

</bundles_post_ra>
